<compile_context>
chip_gen: v6e
topology: v6e:2x2x1
jax: 0.10.0
libtpu: 0.0.40
codegen_flags: <defaults>
</compile_context>

<pallas_src>
import jax
import jax.numpy as jnp
from jax.experimental import pallas as pl
from jax.experimental.pallas import tpu as pltpu

HIDDEN = 300          # nn.Linear(state_dim, 300); nn.LayerNorm(300)
H_PAD = 384           # 3 * 128 lanes
LN_EPS = 1e-5         # PyTorch LayerNorm default eps


def _layernorm_padded(x, gamma, beta, mask):
    """LayerNorm over the first HIDDEN lanes of a (bm, H_PAD) f32 tile.

    x's padded lanes are exactly zero on entry (weights/biases are zero
    padded), so they contribute nothing to the mean sum; the variance masks
    them out because centering makes them -mean.  gamma/beta are zero padded
    so the padded lanes of the result are exact zeros.
    """
    inv_n = 1.0 / HIDDEN
    mean = jnp.sum(x, axis=-1, keepdims=True) * inv_n
    centered = x - mean
    var = jnp.sum(centered * centered * mask, axis=-1, keepdims=True) * inv_n
    inv = jax.lax.rsqrt(var + LN_EPS)
    return centered * inv * gamma + beta


def critic_kernel(s_ref, w1_ref, b1_ref, w3_ref, b3_ref,
                  g_ref, beta_ref, w2_ref, b2_ref, out_ref):
    gamma = g_ref[...]                              # (1, H_PAD) f32
    beta = beta_ref[...]                            # (1, H_PAD) f32

    # Mask of valid (non padded) hidden lanes for the LayerNorm variance.
    lane = jax.lax.broadcasted_iota(jnp.int32, (1, H_PAD), 1)
    mask = (lane < HIDDEN).astype(jnp.float32)      # (1, H_PAD)

    # x = ln(relu(fc1(s)))          -- bf16 MXU inputs, f32 accumulation
    s = s_ref[...].astype(jnp.bfloat16)             # (bm, state_dim)
    h = jnp.dot(s, w1_ref[...], preferred_element_type=jnp.float32)
    h = jnp.maximum(h + b1_ref[...], 0.0)
    h = _layernorm_padded(h, gamma, beta, mask)

    # x = ln(relu(fc3(x)))          -- same LayerNorm params reused (as in module)
    h = jnp.dot(h.astype(jnp.bfloat16), w3_ref[...],
                preferred_element_type=jnp.float32)
    h = jnp.maximum(h + b3_ref[...], 0.0)
    h = _layernorm_padded(h, gamma, beta, mask)

    # out = fc2(x): (bm,384)@(384,1) degenerate matmul replaced by a VPU
    # multiply + lane reduction; result stored lane-dense as a (1, 1, bm) row.
    out_vec = jnp.sum(h * w2_ref[...], axis=-1) + b2_ref[0, 0]   # (bm,) f32
    out_ref[...] = out_vec[None, None, :].astype(out_ref.dtype)


def _pad_params_for_kernel(params):
    """Zero-pad the hidden dim 300 -> 384 and cast the MXU weights to bf16."""
    w1, b1, w3, b3, gamma, beta, w2, b2 = params
    ph = H_PAD - HIDDEN
    w1p = jnp.pad(w1, ((0, 0), (0, ph))).astype(jnp.bfloat16)   # (sd, 384)
    b1p = jnp.pad(b1, ((0, 0), (0, ph)))                        # (1, 384) f32
    w3p = jnp.pad(w3, ((0, ph), (0, ph))).astype(jnp.bfloat16)  # (384, 384)
    b3p = jnp.pad(b3, ((0, 0), (0, ph)))                        # (1, 384) f32
    gp = jnp.pad(gamma, ((0, 0), (0, ph)))                      # (1, 384) f32
    bp = jnp.pad(beta, ((0, 0), (0, ph)))                       # (1, 384) f32
    # fc2 weight as a (1, 384) f32 row for the VPU reduce.
    w2row = jnp.pad(w2.reshape(1, HIDDEN), ((0, 0), (0, ph)))
    return w1p, b1p, w3p, b3p, gp, bp, w2row, b2


def _choose_bm(B):
    """Batch tile: multiple of 8, big enough to fill the MXU M dim (target
    256), but leaving >= 2 grid steps when possible (megacore / v7x)."""
    b8 = ((B + 7) // 8) * 8
    bm = min(256, b8)
    while bm > 8 and pl.cdiv(b8, bm) < 2:
        bm //= 2
    return max(bm, 8)


def critic_forward(s, params, *, bm=None):
    """s: (B, state_dim) float32 -> (B, 1) float32."""
    B, state_dim = s.shape
    if bm is None:
        bm = _choose_bm(B)
    assert bm % 8 == 0

    grid_n = pl.cdiv(B, bm)
    b_pad = grid_n * bm
    if b_pad != B:
        s = jnp.pad(s, ((0, b_pad - B), (0, 0)))

    w1, b1, w3, b3, gamma, beta, w2row, b2 = _pad_params_for_kernel(params)

    def full(arr):
        # Parameter broadcast: constant index map -> DMA'd once, reused.
        return pl.BlockSpec(arr.shape, lambda i: (0,) * arr.ndim)

    # VMEM budget: double-buffered inputs/outputs + in-kernel activations,
    # with generous headroom (capped below the v7x 32 MiB scoped budget).
    est = (2 * bm * state_dim * 4          # s tile, double-buffered
           + 2 * state_dim * H_PAD * 2     # w1 (bf16)
           + 2 * H_PAD * H_PAD * 2         # w3 (bf16)
           + 2 * 6 * H_PAD * 4             # biases / gamma / beta / w2 row
           + 2 * bm * 4                    # output row
           + 6 * bm * H_PAD * 4)           # f32 activation temporaries
    vmem_limit = int(min(32 << 20, max(8 << 20, 2 * est)))

    out3d = pl.pallas_call(
        critic_kernel,
        out_shape=jax.ShapeDtypeStruct((grid_n, 1, bm), jnp.float32),
        grid_spec=pltpu.PrefetchScalarGridSpec(
            num_scalar_prefetch=0,
            grid=(grid_n,),
            in_specs=[
                pl.BlockSpec((bm, state_dim), lambda i: (i, 0)),   # s
                full(w1), full(b1),
                full(w3), full(b3),
                full(gamma), full(beta),
                full(w2row), full(b2),
            ],
            out_specs=pl.BlockSpec((1, 1, bm), lambda i: (i, 0, 0)),
        ),
        compiler_params=pltpu.CompilerParams(
            dimension_semantics=("parallel",),
            vmem_limit_bytes=vmem_limit),
    )(s, w1, b1, w3, b3, gamma, beta, w2row, b2)

    return out3d.reshape(b_pad, 1)[:B]


def init_params(key, state_dim):
    """Deterministic init mimicking PyTorch nn.Linear defaults
    (uniform(-1/sqrt(fan_in), 1/sqrt(fan_in))).  Weights stored as
    (in_features, out_features) so the kernel computes x @ W + b."""
    ks = jax.random.split(key, 6)

    def lin(kw, kb, fan_in, fan_out):
        bound = 1.0 / jnp.sqrt(jnp.float32(fan_in))
        w = jax.random.uniform(kw, (fan_in, fan_out), jnp.float32, -bound, bound)
        b = jax.random.uniform(kb, (1, fan_out), jnp.float32, -bound, bound)
        return w, b

    w1, b1 = lin(ks[0], ks[1], state_dim, HIDDEN)   # fc1
    w3, b3 = lin(ks[2], ks[3], HIDDEN, HIDDEN)      # fc3
    w2, b2 = lin(ks[4], ks[5], HIDDEN, 1)           # fc2
    gamma = jnp.ones((1, HIDDEN), jnp.float32)      # LayerNorm weight
    beta = jnp.zeros((1, HIDDEN), jnp.float32)      # LayerNorm bias
    return (w1, b1, w3, b3, gamma, beta, w2, b2)


def critic_ref(s, params):
    """Pure-JAX f32 reference (unpadded) for correctness checking."""
    w1, b1, w3, b3, gamma, beta, w2, b2 = params

    def ln(x):
        mean = jnp.mean(x, axis=-1, keepdims=True)
        c = x - mean
        var = jnp.mean(c * c, axis=-1, keepdims=True)
        return c * jax.lax.rsqrt(var + LN_EPS) * gamma + beta

    x = ln(jnp.maximum(s @ w1 + b1, 0.0))
    x = ln(jnp.maximum(x @ w3 + b3, 0.0))
    return x @ w2 + b2


if __name__ == "__main__":
    B, state_dim = 16, 32
    key = jax.random.PRNGKey(0)
    k_s, k_p = jax.random.split(key)

    s = jax.random.normal(k_s, (B, state_dim), jnp.float32)
    params = init_params(k_p, state_dim)

    out = critic_forward(s, params)       # bm=8 -> grid=(2,), 2 parallel steps
    out = jax.block_until_ready(out)

    ref = critic_ref(s, params)
    assert out.shape == (B, 1)
    max_err = jnp.max(jnp.abs(out - ref))
    # bf16 MXU inputs (f32 accumulation) -> relaxed tolerance vs. f32 reference.
    assert jnp.allclose(out, ref, atol=5e-2, rtol=5e-2), f"max abs err {max_err}"

    print("KERNEL_OK")
</pallas_src>

<mosaic_0001>
module attributes {stable_mosaic.version = 11 : i64} {
  func.func @critic_kernel(%arg0: i32, %arg1: memref<8x32xf32, #tpu.memory_space<vmem>>, %arg2: memref<32x384xbf16, #tpu.memory_space<vmem>>, %arg3: memref<1x384xf32, #tpu.memory_space<vmem>>, %arg4: memref<384x384xbf16, #tpu.memory_space<vmem>>, %arg5: memref<1x384xf32, #tpu.memory_space<vmem>>, %arg6: memref<1x384xf32, #tpu.memory_space<vmem>>, %arg7: memref<1x384xf32, #tpu.memory_space<vmem>>, %arg8: memref<1x384xf32, #tpu.memory_space<vmem>>, %arg9: memref<1x1xf32, #tpu.memory_space<vmem>>, %arg10: memref<1x1x8xf32, #tpu.memory_space<vmem>>) attributes {dimension_semantics = [#tpu.dimension_semantics<parallel>], iteration_bounds = array<i64: 2>, scalar_prefetch = 0 : i64, scratch_operands = 0 : i64, tpu.core_type = #tpu.core_type<tc>, window_params = [{transform_indices = @transform_0, window_bounds = array<i64: 8, 32>}, {pipeline_mode = #tpu.pipeline_mode<synchronous>, transform_indices = @transform_1, window_bounds = array<i64: 32, 384>}, {pipeline_mode = #tpu.pipeline_mode<synchronous>, transform_indices = @transform_2, window_bounds = array<i64: 1, 384>}, {pipeline_mode = #tpu.pipeline_mode<synchronous>, transform_indices = @transform_3, window_bounds = array<i64: 384, 384>}, {pipeline_mode = #tpu.pipeline_mode<synchronous>, transform_indices = @transform_4, window_bounds = array<i64: 1, 384>}, {pipeline_mode = #tpu.pipeline_mode<synchronous>, transform_indices = @transform_5, window_bounds = array<i64: 1, 384>}, {pipeline_mode = #tpu.pipeline_mode<synchronous>, transform_indices = @transform_6, window_bounds = array<i64: 1, 384>}, {pipeline_mode = #tpu.pipeline_mode<synchronous>, transform_indices = @transform_7, window_bounds = array<i64: 1, 384>}, {pipeline_mode = #tpu.pipeline_mode<synchronous>, transform_indices = @transform_8, window_bounds = array<i64: 1, 1>}, {transform_indices = @transform_9, window_bounds = array<i64: 1, 1, 8>}]} {
    %c0 = arith.constant 0 : index
    %c0_0 = arith.constant 0 : index
    %0 = vector.load %arg6[%c0, %c0_0] : memref<1x384xf32, #tpu.memory_space<vmem>>, vector<1x384xf32>
    %c0_1 = arith.constant 0 : index
    %c0_2 = arith.constant 0 : index
    %1 = vector.load %arg7[%c0_1, %c0_2] : memref<1x384xf32, #tpu.memory_space<vmem>>, vector<1x384xf32>
    %2 = tpu.iota {dimensions = array<i32: 1>} : vector<1x384xi32>
    %c300_i32 = arith.constant 300 : i32
    %3 = vector.broadcast %c300_i32 : i32 to vector<1x384xi32>
    %4 = arith.cmpi slt, %2, %3 : vector<1x384xi32>
    %5 = arith.extui %4 : vector<1x384xi1> to vector<1x384xi32>
    %6 = arith.sitofp %5 : vector<1x384xi32> to vector<1x384xf32>
    %c0_3 = arith.constant 0 : index
    %c0_4 = arith.constant 0 : index
    %7 = vector.load %arg1[%c0_3, %c0_4] : memref<8x32xf32, #tpu.memory_space<vmem>>, vector<8x32xf32>
    %8 = arith.truncf %7 : vector<8x32xf32> to vector<8x32xbf16>
    %c0_5 = arith.constant 0 : index
    %c0_6 = arith.constant 0 : index
    %9 = vector.load %arg2[%c0_5, %c0_6] : memref<32x384xbf16, #tpu.memory_space<vmem>>, vector<32x384xbf16>
    %cst = arith.constant dense<0.000000e+00> : vector<8x384xf32>
    %10 = tpu.matmul %8, %9, %cst {dimension_numbers = #tpu.dot_dimension_numbers<[1], [0], [0], [1], [0, 0, 1, 1], [], []>} : vector<8x32xbf16>, vector<32x384xbf16>, vector<8x384xf32> -> vector<8x384xf32>
    %c0_7 = arith.constant 0 : index
    %c0_8 = arith.constant 0 : index
    %11 = vector.load %arg3[%c0_7, %c0_8] : memref<1x384xf32, #tpu.memory_space<vmem>>, vector<1x384xf32>
    %12 = vector.broadcast %11 : vector<1x384xf32> to vector<8x384xf32>
    %13 = arith.addf %10, %12 : vector<8x384xf32>
    %cst_9 = arith.constant 0.000000e+00 : f32
    %14 = vector.broadcast %cst_9 : f32 to vector<8x384xf32>
    %15 = arith.maximumf %13, %14 : vector<8x384xf32>
    %cst_10 = arith.constant dense<0.000000e+00> : vector<8xf32>
    %16 = vector.multi_reduction <add>, %15, %cst_10 [1] : vector<8x384xf32> to vector<8xf32>
    %17 = vector.shape_cast %16 : vector<8xf32> to vector<8x1xf32>
    %cst_11 = arith.constant 0.00333333341 : f32
    %18 = vector.broadcast %cst_11 : f32 to vector<8x1xf32>
    %19 = arith.mulf %17, %18 : vector<8x1xf32>
    %20 = vector.broadcast %19 : vector<8x1xf32> to vector<8x384xf32>
    %21 = arith.subf %15, %20 : vector<8x384xf32>
    %22 = arith.mulf %21, %21 : vector<8x384xf32>
    %23 = vector.broadcast %6 : vector<1x384xf32> to vector<8x384xf32>
    %24 = arith.mulf %22, %23 : vector<8x384xf32>
    %cst_12 = arith.constant dense<0.000000e+00> : vector<8xf32>
    %25 = vector.multi_reduction <add>, %24, %cst_12 [1] : vector<8x384xf32> to vector<8xf32>
    %26 = vector.shape_cast %25 : vector<8xf32> to vector<8x1xf32>
    %cst_13 = arith.constant 0.00333333341 : f32
    %27 = vector.broadcast %cst_13 : f32 to vector<8x1xf32>
    %28 = arith.mulf %26, %27 : vector<8x1xf32>
    %cst_14 = arith.constant 9.99999974E-6 : f32
    %29 = vector.broadcast %cst_14 : f32 to vector<8x1xf32>
    %30 = arith.addf %28, %29 : vector<8x1xf32>
    %31 = math.rsqrt %30 : vector<8x1xf32>
    %32 = vector.broadcast %31 : vector<8x1xf32> to vector<8x384xf32>
    %33 = arith.mulf %21, %32 : vector<8x384xf32>
    %34 = vector.broadcast %0 : vector<1x384xf32> to vector<8x384xf32>
    %35 = arith.mulf %33, %34 : vector<8x384xf32>
    %36 = vector.broadcast %1 : vector<1x384xf32> to vector<8x384xf32>
    %37 = arith.addf %35, %36 : vector<8x384xf32>
    %38 = arith.truncf %37 : vector<8x384xf32> to vector<8x384xbf16>
    %c0_15 = arith.constant 0 : index
    %c0_16 = arith.constant 0 : index
    %39 = vector.load %arg4[%c0_15, %c0_16] : memref<384x384xbf16, #tpu.memory_space<vmem>>, vector<384x384xbf16>
    %cst_17 = arith.constant dense<0.000000e+00> : vector<8x384xf32>
    %40 = tpu.matmul %38, %39, %cst_17 {dimension_numbers = #tpu.dot_dimension_numbers<[1], [0], [0], [1], [0, 0, 1, 1], [], []>} : vector<8x384xbf16>, vector<384x384xbf16>, vector<8x384xf32> -> vector<8x384xf32>
    %c0_18 = arith.constant 0 : index
    %c0_19 = arith.constant 0 : index
    %41 = vector.load %arg5[%c0_18, %c0_19] : memref<1x384xf32, #tpu.memory_space<vmem>>, vector<1x384xf32>
    %42 = vector.broadcast %41 : vector<1x384xf32> to vector<8x384xf32>
    %43 = arith.addf %40, %42 : vector<8x384xf32>
    %cst_20 = arith.constant 0.000000e+00 : f32
    %44 = vector.broadcast %cst_20 : f32 to vector<8x384xf32>
    %45 = arith.maximumf %43, %44 : vector<8x384xf32>
    %cst_21 = arith.constant dense<0.000000e+00> : vector<8xf32>
    %46 = vector.multi_reduction <add>, %45, %cst_21 [1] : vector<8x384xf32> to vector<8xf32>
    %47 = vector.shape_cast %46 : vector<8xf32> to vector<8x1xf32>
    %cst_22 = arith.constant 0.00333333341 : f32
    %48 = vector.broadcast %cst_22 : f32 to vector<8x1xf32>
    %49 = arith.mulf %47, %48 : vector<8x1xf32>
    %50 = vector.broadcast %49 : vector<8x1xf32> to vector<8x384xf32>
    %51 = arith.subf %45, %50 : vector<8x384xf32>
    %52 = arith.mulf %51, %51 : vector<8x384xf32>
    %53 = vector.broadcast %6 : vector<1x384xf32> to vector<8x384xf32>
    %54 = arith.mulf %52, %53 : vector<8x384xf32>
    %cst_23 = arith.constant dense<0.000000e+00> : vector<8xf32>
    %55 = vector.multi_reduction <add>, %54, %cst_23 [1] : vector<8x384xf32> to vector<8xf32>
    %56 = vector.shape_cast %55 : vector<8xf32> to vector<8x1xf32>
    %cst_24 = arith.constant 0.00333333341 : f32
    %57 = vector.broadcast %cst_24 : f32 to vector<8x1xf32>
    %58 = arith.mulf %56, %57 : vector<8x1xf32>
    %cst_25 = arith.constant 9.99999974E-6 : f32
    %59 = vector.broadcast %cst_25 : f32 to vector<8x1xf32>
    %60 = arith.addf %58, %59 : vector<8x1xf32>
    %61 = math.rsqrt %60 : vector<8x1xf32>
    %62 = vector.broadcast %61 : vector<8x1xf32> to vector<8x384xf32>
    %63 = arith.mulf %51, %62 : vector<8x384xf32>
    %64 = vector.broadcast %0 : vector<1x384xf32> to vector<8x384xf32>
    %65 = arith.mulf %63, %64 : vector<8x384xf32>
    %66 = vector.broadcast %1 : vector<1x384xf32> to vector<8x384xf32>
    %67 = arith.addf %65, %66 : vector<8x384xf32>
    %c0_26 = arith.constant 0 : index
    %c0_27 = arith.constant 0 : index
    %68 = vector.load %arg8[%c0_26, %c0_27] : memref<1x384xf32, #tpu.memory_space<vmem>>, vector<1x384xf32>
    %69 = vector.broadcast %68 : vector<1x384xf32> to vector<8x384xf32>
    %70 = arith.mulf %67, %69 : vector<8x384xf32>
    %cst_28 = arith.constant dense<0.000000e+00> : vector<8xf32>
    %71 = vector.multi_reduction <add>, %70, %cst_28 [1] : vector<8x384xf32> to vector<8xf32>
    %c0_29 = arith.constant 0 : index
    %c0_30 = arith.constant 0 : index
    %72 = vector.load %arg9[%c0_29, %c0_30] : memref<1x1xf32, #tpu.memory_space<vmem>>, vector<1x1xf32>
    %73 = vector.extract %72[0, 0] : f32 from vector<1x1xf32>
    %74 = vector.broadcast %73 : f32 to vector<8xf32>
    %75 = arith.addf %71, %74 : vector<8xf32>
    %76 = vector.shape_cast %75 : vector<8xf32> to vector<1x1x8xf32>
    %c0_31 = arith.constant 0 : index
    %c0_32 = arith.constant 0 : index
    %c0_33 = arith.constant 0 : index
    %77 = vector.load %arg10[%c0_31, %c0_32, %c0_33] : memref<1x1x8xf32, #tpu.memory_space<vmem>>, vector<1x1x8xf32>
    tpu.vector_store %arg10[%c0_31, %c0_32, %c0_33], %76 {strides = array<i32>} : memref<1x1x8xf32, #tpu.memory_space<vmem>>, vector<1x1x8xf32>,
    return
  }
  func.func @transform_0(%arg0: i32) -> (i32, i32) {
    %c0_i32 = arith.constant 0 : i32
    %c0_i32_0 = arith.constant 0 : i32
    return %arg0, %c0_i32 : i32, i32
  }
  func.func @transform_1(%arg0: i32) -> (i32, i32) {
    %c0_i32 = arith.constant 0 : i32
    %c0_i32_0 = arith.constant 0 : i32
    %c0_i32_1 = arith.constant 0 : i32
    return %c0_i32, %c0_i32_0 : i32, i32
  }
  func.func @transform_2(%arg0: i32) -> (i32, i32) {
    %c0_i32 = arith.constant 0 : i32
    %c0_i32_0 = arith.constant 0 : i32
    %c0_i32_1 = arith.constant 0 : i32
    return %c0_i32, %c0_i32_0 : i32, i32
  }
  func.func @transform_3(%arg0: i32) -> (i32, i32) {
    %c0_i32 = arith.constant 0 : i32
    %c0_i32_0 = arith.constant 0 : i32
    %c0_i32_1 = arith.constant 0 : i32
    return %c0_i32, %c0_i32_0 : i32, i32
  }
  func.func @transform_4(%arg0: i32) -> (i32, i32) {
    %c0_i32 = arith.constant 0 : i32
    %c0_i32_0 = arith.constant 0 : i32
    %c0_i32_1 = arith.constant 0 : i32
    return %c0_i32, %c0_i32_0 : i32, i32
  }
  func.func @transform_5(%arg0: i32) -> (i32, i32) {
    %c0_i32 = arith.constant 0 : i32
    %c0_i32_0 = arith.constant 0 : i32
    %c0_i32_1 = arith.constant 0 : i32
    return %c0_i32, %c0_i32_0 : i32, i32
  }
  func.func @transform_6(%arg0: i32) -> (i32, i32) {
    %c0_i32 = arith.constant 0 : i32
    %c0_i32_0 = arith.constant 0 : i32
    %c0_i32_1 = arith.constant 0 : i32
    return %c0_i32, %c0_i32_0 : i32, i32
  }
  func.func @transform_7(%arg0: i32) -> (i32, i32) {
    %c0_i32 = arith.constant 0 : i32
    %c0_i32_0 = arith.constant 0 : i32
    %c0_i32_1 = arith.constant 0 : i32
    return %c0_i32, %c0_i32_0 : i32, i32
  }
  func.func @transform_8(%arg0: i32) -> (i32, i32) {
    %c0_i32 = arith.constant 0 : i32
    %c0_i32_0 = arith.constant 0 : i32
    %c0_i32_1 = arith.constant 0 : i32
    return %c0_i32, %c0_i32_0 : i32, i32
  }
  func.func @transform_9(%arg0: i32) -> (i32, i32, i32) {
    %c0_i32 = arith.constant 0 : i32
    %c0_i32_0 = arith.constant 0 : i32
    %c0_i32_1 = arith.constant 0 : i32
    return %arg0, %c0_i32, %c0_i32_0 : i32, i32, i32
  }
}

</mosaic_0001>

<bundles_post_ra>
// kernel: tpu_custom_call.1
= control target key start
LH: loop header
LB: loop body
LE: loop exit
PB: predicated region body
PF: predicated region fallthrough
CT: control target
= control target key end

     0   :  { %s2343_s0 = inlined_call_operand.hbm [shape: f32[16,32], index: 0, kind: input, shape index: {}]   ;;  %s2344_s1 = inlined_call_operand.hbm [shape: bf16[32,384], index: 1, kind: input, shape index: {}]   ;;  %s2345_s2 = inlined_call_operand.vmem [shape: f32[1,384], index: 2, kind: input, shape index: {}]   ;;  %s2346_s3 = inlined_call_operand.hbm [shape: bf16[384,384], index: 3, kind: input, shape index: {}]   ;;  %s2347_s4 = inlined_call_operand.vmem [shape: f32[1,384], index: 4, kind: input, shape index: {}]   ;;  %s2348_s5 = inlined_call_operand.vmem [shape: f32[1,384], index: 5, kind: input, shape index: {}]   ;;  %s2349_s6 = inlined_call_operand.vmem [shape: f32[1,384], index: 6, kind: input, shape index: {}]   ;;  %s2350_s7 = inlined_call_operand.hbm [shape: f32[1,384], index: 7, kind: input, shape index: {}]   ;;  %s2351_s8 = inlined_call_operand.<no memory space> [shape: f32[1,1], index: 8, kind: input, shape index: {}]   ;;  %s2352_s9 = inlined_call_operand.hbm [shape: f32[2,1,8], index: 9, kind: output, shape index: {}]  }
   0x1   :  { %2357 = sst [smem:[#allocation16_spill]] %s2344_s1  ;;  %v14_v0 = vstv %s2351_s8 }
   0x2   :  { %2358 = sst [smem:[#allocation17_spill]] %s2346_s3  ;;  %15 = vst [vmem:[#allocation2] sm:$0x1] %v14_v0 }
   0x3   :  { %2359 = sst [smem:[#allocation18_spill]] %s2350_s7 }
   0x4   :  { %16 = vsyncpa [#allocation4], 0 }
   0x5   :  { %18 = vsyncpa [#allocation4 + $0x1], 0 }
   0x6   :  { %19 = vsyncpa [#allocation7], 0 }
   0x7   :  { %20 = vsyncpa [#allocation10], 0 }
   0x8   :  { %21 = vsyncpa [#allocation5], 0 }
   0x9   :  { %23 = vsyncpa [#allocation5 + $0x1], 0  ;;  %s2049_s11 = smov 0   ;;  %s2051_s12 = smov 0  }
   0xa   :  { %s2053_s13 = smov 0   ;;  %s2055_s14 = smov 0  }
   0xb LB: > { %s2070_s8 = sadd.s32 4294967295, %s1984_s14   ;;  %s1455_s15 = sadd.s32 4294967294, %s1984_s14   ;;  %s1984_s14 = sphi %s2055_s14, %s2382_s14   ;;  %s1980_s13 = sphi %s2053_s13, %s2381_s13   ;;  %s1976_s12 = sphi %s2051_s12, %s2380_s12   ;;  %s1972_s11 = sphi %s2049_s11, %s2379_s11  }
   0xc   : > { %p49_p0 = scmp.ne.s32.totalorder %s1976_s12, %s1972_s11  ;;  %p2353_p1 = scmp.eq.s32.totalorder %s2070_s8, 0 }
   0xd   : > { %p247_p3 = scmp.eq.s32.totalorder %s1455_s15, 1  ;;  %p1456_p5 = scmp.ge.s32.totalorder %s1984_s14, 1 }
   0xe   : > { %p2079_p4 = por %p2353_p1, %p49_p0  ;;  %p254_p7 = scmp.lt.s32.totalorder %s1984_s14, 3 }
   0xf   : > { %p2084_p6 = por %p247_p3, %p49_p0  ;;  %s1986_s19 = smov [#allocation6]  }
  0x10   : > { %s2360_s16 = scalar_select %p2079_p4, 1, 0 }
  0x11   : > { %s2361_s17 = scalar_select %p2084_p6, 1, 0 }
  0x12   : > { %p2089_p8 = pnand %p1456_p5, %p254_p7  ;;  %s266_s20 = sshll.u32 %s1986_s19, 4  ;;  %s267_s20 = int_to_ptr.vmem [resolvable:$true] %s266_s20 }
  0x13   : > { %s1987_s22 = smov [#allocation8]   ;;  %s1988_s24 = smov [#allocation9]  }
  0x14   : > { %s2362_s18 = scalar_select %p2089_p8, 1, 0 }
  0x15   : > { %p1632_p9 = pneg %p2089_p8  ;;  %s282_s23 = sshll.u32 %s1987_s22, 4  ;;  %s283_s23 = int_to_ptr.vmem [resolvable:$true] %s282_s23 }
  0x16   : > { %s305_s25 = sshll.u32 %s1988_s24, 4  ;;  %s1817_s26 = scalar_lea.vmem %s267_s20, 768  ;;  %s306_s25 = int_to_ptr.vmem [resolvable:$true] %s305_s25 }
  0x17   : > { %p2098_p11 = pnand %p1632_p9, %p2353_p1  ;;  %p1818_p13 = scmp.ne.s32.totalorder %s267_s20, %s1817_s26 }
  0x18   : > { %p1825_p5 = scmp.lt.s32.totalorder %s267_s20, %s267_s20  ;;  %p1826_p7 = scmp.lt.s32.totalorder %s1817_s26, %s1817_s26 }
  0x19   : > { %p1808_p12 = pneg %p2098_p11 }
  0x1a   : > { %p1827_p9 = por %p1826_p7, %p1825_p5 }
  0x1b   : > { %p1820_p0 = pnand %p1818_p13, %p1808_p12 }
  0x1d   : > { %p1821_p3 = pneg %p1820_p0 }
  0x1f   : > { %p1828_p10 = pnand %p1827_p9, %p1821_p3 }
  0x21   : > { %1831 = shalt.err (!%p1828_p10)
}
  0x22   : > { %s1989_s27 = smov 192   ;;  %s1990_s28 = smov 12  }
  0x23   : > { %s2364_s1 = sld [smem:[#allocation16_spill]]  ;;  %s1843_s10 = scalar_lea.vmem %s283_s23, 9216 }
  0x24   : > { %p1844_p1 = scmp.ne.s32.totalorder %s283_s23, %s1843_s10  ;;  %p1851_p2 = scmp.lt.s32.totalorder %s283_s23, %s283_s23 }
  0x25   : > { %p1852_p6 = scmp.lt.s32.totalorder %s1843_s10, %s1843_s10 }
  0x26   : > { %p1846_p13 = pnand %p1844_p1, %p1808_p12 }
  0x27   : > { %p1853_p5 = por %p1852_p6, %p1851_p2 }
  0x28   : > { %p1847_p0 = pneg %p1846_p13 }
  0x29   : > { %1635 = dma.hbm_to_vmem [thread:$0]  (!%p2098_p11), %s2364_s1, 768, %s267_s20, [#allocation7], %s1989_s27, %s1989_s27, %s1990_s28  }
  0x2a   : > { %p1854_p3 = pnand %p1853_p5, %p1847_p0 }
  0x2c   : > { %1857 = shalt.err (!%p1854_p3)
}
  0x2d   : > { %s2365_s3 = sld [smem:[#allocation17_spill]]  ;;  %s1869_s20 = scalar_lea.vmem %s306_s25, 48 }
  0x2e   : > { %p1870_p10 = scmp.ne.s32.totalorder %s306_s25, %s1869_s20  ;;  %s1876_s22 = scalar_lea.vmem %s306_s25, 64 }
  0x2f   : > { %p1877_p9 = scmp.lt.s32.totalorder %s306_s25, %s306_s25  ;;  %p1878_p13 = scmp.lt.s32.totalorder %s1876_s22, %s1869_s20 }
  0x30   : > { %p1872_p7 = pnand %p1870_p10, %p1808_p12 }
  0x31   : > { %p1879_p2 = por %p1878_p13, %p1877_p9 }
  0x32   : > { %p1873_p1 = pneg %p1872_p7 }
  0x33   : > { %1638 = dma.hbm_to_vmem [thread:$0]  (!%p2098_p11), %s2365_s3, 9216, %s283_s23, [#allocation7], %s1989_s27, %s1989_s27, %s1990_s28  }
  0x34   : > { %p1880_p6 = pnand %p1879_p2, %p1873_p1 }
  0x36   : > { %1883 = shalt.err (!%p1880_p6)
}
  0x37   : > { %s2366_s7 = sld [smem:[#allocation18_spill]]  ;;  %s2129_s23 = sadd.s32 1, %s1984_s14  }
  0x38   : > { %s33_s27 = ssub.s32 %s1984_s14, %s2129_s23  ;;  %s36_s21 = sadd.s32 1, %s1980_s13 }
  0x39   : > { %p34_p12 = scmp.eq.s32.totalorder %s33_s27, 0  ;;  %p43_p0 = scmp.ne.s32.totalorder %s1980_s13, %s1976_s12 }
  0x3a   : > { %p44_p5 = scmp.eq.s32.totalorder %s1984_s14, 0  ;;  %p1653_p3 = scmp.lt.s32.totalorder %s1984_s14, 2 }
  0x3b   : > { %s2139_s28 = scalar_select %p34_p12, %s1980_s13, %s36_s21  }
  0x3c   : > { %p45_p10 = por %p44_p5, %p43_p0  ;;  %p2367_p7 = scmp.eq.s32.totalorder %s2070_s8, 1 }
  0x3d   : > { %1641 = dma.hbm_to_vmem [thread:$0]  (!%p2098_p11), %s2366_s7, 48, %s306_s25, [#allocation10]  }
  0x3e   : > { %p2143_p1 = por %p2367_p7, %p43_p0  ;;  %s319_s30 = sand.u32 1, %s1980_s13  }
  0x3f   : > { %s1462_s10 = sshll.u32 %s1984_s14, 7  ;;  %s1461_s25 = sshll.u32 %s319_s30, 3 }
  0x40   : > { %s2368_s29 = scalar_select %p2143_p1, 1, 0 }
  0x41   : > { %s2152_s20 = scalar_lea.hbm %s2343_s0, %s1462_s10  ;;  %s323_s22 = scalar_lea.vmem [#allocation3], %s1461_s25 }
  0x42   : > { %s330_s24 = sshll.u32 %s323_s22, 4  ;;  %p2154_p11 = pnand %p1653_p3, %p45_p10  ;;  %s331_s24 = int_to_ptr.vmem [resolvable:$true] %s330_s24 }
  0x43   : > { %s320_s27 = scalar_lea.sflag [#allocation4], %s319_s30  ;;  %s1884_s21 = scalar_lea.hbm %s2152_s20, 128 }
  0x44   : > { %p1885_p9 = scmp.ne.s32.totalorder %s2152_s20, %s1884_s21  ;;  %p1886_p13 = pneg %p2154_p11 }
  0x45   : > { %s1889_s19 = scalar_lea.hbm %s2343_s0, 256  ;;  %p1890_p12 = scmp.lt.s32.totalorder %s2152_s20, %s2343_s0 }
  0x46   : > { %p1887_p2 = pnand %p1886_p13, %p1885_p9  ;;  %p1891_p0 = scmp.lt.s32.totalorder %s1889_s19, %s1884_s21 }
  0x48   : > { %p1888_p6 = pneg %p1887_p2  ;;  %p1892_p5 = por %p1891_p0, %p1890_p12 }
  0x4a   : > { %p1893_p3 = pnand %p1892_p5, %p1888_p6 }
  0x4c   : > { %1896 = shalt.err (!%p1893_p3)
}
  0x4d   : > { %s1897_s22 = scalar_lea.vmem %s331_s24, 128  ;;  %s1991_s30 = smov [#allocation3]  }
  0x4e   : > { %p1898_p10 = scmp.ne.s32.totalorder %s331_s24, %s1897_s22  ;;  %s1902_s3 = sshll.u32 %s1991_s30, 4  ;;  %s1903_s3 = int_to_ptr.vmem [resolvable:$false] %s1902_s3 }
  0x4f   : > { %s1904_s7 = scalar_lea.vmem %s1903_s3, 256  ;;  %p1905_p9 = scmp.lt.s32.totalorder %s331_s24, %s1903_s3 }
  0x50   : > { %p1900_p7 = pnand %p1898_p10, %p1886_p13  ;;  %p1906_p2 = scmp.lt.s32.totalorder %s1904_s7, %s1897_s22 }
  0x52   : > { %p1901_p1 = pneg %p1900_p7  ;;  %p1907_p4 = por %p1906_p2, %p1905_p9 }
  0x54   : > { %p1908_p8 = pnand %p1907_p4, %p1901_p1 }
  0x56   : > { %1911 = shalt.err (!%p1908_p8)
}
  0x57   : > { %1645 = dma.hbm_to_vmem [thread:$0]  (!%p2154_p11), %s2152_s20, 128, %s331_s24, %s320_s27  }
  0x58   : > { %p2370_p6 = scmp.ne.s32.totalorder %s2362_s18, 0 }
  0x59   : > { %s2175_s1 = sand.u32 (!%p2370_p6), 1, %s1976_s12   ;;  %p2371_p13 = scmp.ne.s32.totalorder (!%p2370_p6), %s2360_s16, 0 }
  0x5a   : > { %339 = sbr.rel (%p2370_p6) target bundleno = 1338 (0x53a), region = 56  ;;  %s1464_s21 = sshll.u32 (!%p2370_p6), %s2175_s1, 3 }
  0x5b   : > { %s342_s10 = scalar_lea.sflag (!%p2370_p6), [#allocation4], %s2175_s1  ;;  %s345_s3 = scalar_lea.vmem (!%p2370_p6), [#allocation3], %s1464_s21 }
  0x5f   : > { %1955 = dma.done.wait (%p2371_p13), %s342_s10, 128  }
  0x60   : > { %1957 = vsyncadd (%p2371_p13), %s342_s10, 4294967168  ;;  %p2372_p4 = scmp.eq.s32.totalorder %s2070_s8, 0 }
  0x62   : > { %1959 = dma.done.wait (%p2372_p4), [#allocation7], 9984   ;;  %p2373_p8 = pmov %p2372_p4 }
  0x63   : > { %p2374_p1 = pmov %p2372_p4 }
  0x64   : > { %1961 = vsyncadd (%p2373_p8), [#allocation7], 4294957312 }
  0x65   : > { %1963 = dma.done.wait (%p2374_p1), [#allocation10], 48   ;;  %p2375_p11 = pmov %p2374_p1 }
  0x66   : > { %v1992_v1 = vmov 0   ;;  %v1698_v2 = vld [vmem:[#allocation6 + $0x1c] ss:$12 sps:$4 sm:$0xff]   ;;  %v1700_v3 = vld [vmem:[#allocation6 + $0x18] ss:$12 sps:$4 sm:$0xff]   ;;  %vm466_vm0 = vcmask 261120   ;;  %v394_v11 = vlaneseq }
  0x67   : > { %1965 = vsyncadd (%p2375_p11), [#allocation10], 4294967248  ;;  %502 = vmatprep.mubr.bf16.mxu1 %v1992_v1  ;;  %482 = vmatprep.subr.bf16.mxu1 %v1698_v2  ;;  %v1701_v4 = vld [vmem:[#allocation6 + $0x4] ss:$12 sps:$4 sm:$0xff]   ;;  %v1703_v5 = vld [vmem:[#allocation6] ss:$12 sps:$4 sm:$0xff]  }
  0x68   : > { %483 = vmatpush1.bf16.msra.mxu1 %v1700_v3  ;;  %v407_v6 = vld [vmem:[%s345_s3] sm:$0xff]  ;;  %v1704_v7 = vld [vmem:[#allocation6 + $0x20] ss:$12 sps:$4 sm:$0xff]   ;;  %v1993_v9 = vmov 0.0   ;;  %vm1994_vm1 = vmmov 0   ;;  %v2196_v12 = vshrl.u32 %v394_v11, 7 }
  0x69   : > { %484 = vmatprep.subr.bf16.mxu1 %v1701_v4  ;;  %v408_v8 = vpack.c.bf16 %v407_v6, %v407_v6  ;;  %v1705_v10 = vld [vmem:[#allocation6 + $0x8] ss:$12 sps:$4 sm:$0xff]   ;;  %v417_v15 = vld [vmem:[%s2345_s2] sm:$0x7]  ;;  %v1708_v37 = vld [vmem:[#allocation8 + $0xa8] ss:$12 sps:$4 sm:$0xff]  }
  0x6a   : > { %v2199_v13 = vsub.s32 1, %v2196_v12  ;;  %v2202_v14 = vsub.s32 0, %v2196_v12  ;;  %v2210_v19 = vsub.s32 2, %v2196_v12  ;;  %v1706_v36 = vld [vmem:[#allocation8 + $0xac] ss:$12 sps:$4 sm:$0xff]   ;;  %v2225_v60 = vand.u32 127, %v394_v11 }
  0x6b   : > { %v1709_v38 = vld [vmem:[#allocation8 + $0x94] ss:$12 sps:$4 sm:$0xff]   ;;  %1116 = vmatprep.subr.bf16.mxu0 %v1706_v36  ;;  %v1711_v39 = vld [vmem:[#allocation8 + $0x90] ss:$12 sps:$4 sm:$0xff]   ;;  %v1732_v42 = vld [vmem:[#allocation8 + $0x22c] ss:$12 sps:$4 sm:$0xff]  }
  0x6c   : > { %485 = vmatpush1.bf16.msra.mxu1 %v1703_v5  ;;  %v426_v16 = vrot.slane %v417_v15, %v2199_v13  ;;  %v422_v18 = vrot.slane %v417_v15, %v2202_v14  ;;  %v430_v24 = vrot.slane %v417_v15, %v2210_v19  ;;  %1117 = vmatpush1.bf16.msra.mxu0 %v1708_v37  ;;  %v1712_v40 = vld [vmem:[#allocation8 + $0x7c] ss:$12 sps:$4 sm:$0xff]   ;;  %v1714_v43 = vld [vmem:[#allocation8 + $0x78] ss:$12 sps:$4 sm:$0xff]   ;;  %v1738_v44 = vld [vmem:[#allocation8 + $0x214] ss:$12 sps:$4 sm:$0xff]  }
  0x6d   : > { %1586 = vmatprep.subr.bf16.mxu1 %v1993_v9  ;;  %1118 = vmatprep.subr.bf16.mxu0 %v1709_v38  ;;  %v1730_v41 = vld [vmem:[#allocation8 + $0x228] ss:$12 sps:$4 sm:$0xff]   ;;  %v1715_v45 = vld [vmem:[#allocation8 + $0x64] ss:$12 sps:$4 sm:$0xff]   ;;  %v1717_v47 = vld [vmem:[#allocation8 + $0x60] ss:$12 sps:$4 sm:$0xff]  }
  0x6e   : > { %v1736_v46 = vld [vmem:[#allocation8 + $0x210] ss:$12 sps:$4 sm:$0xff]   ;;  %v1718_v48 = vld [vmem:[#allocation8 + $0x4c] ss:$12 sps:$4 sm:$0xff]   ;;  %v1720_v49 = vld [vmem:[#allocation8 + $0x48] ss:$12 sps:$4 sm:$0xff]  }
  0x6f   : > { %1475 = vmatmul.mubr.msk.bf16.vlgmr.msra.gmra.mxu1 %vm466_vm0, %v408_v8  ;;  %v1721_v50 = vld [vmem:[#allocation8 + $0x34] ss:$12 sps:$4 sm:$0xff]   ;;  %v1723_v51 = vld [vmem:[#allocation8 + $0x30] ss:$12 sps:$4 sm:$0xff]   ;;  %v1726_v53 = vld [vmem:[#allocation8 + $0x18] ss:$12 sps:$4 sm:$0xff]  }
  0x70   : > { %1587 = vmatpush3.bf16.msra.mxu1 %v1704_v7  ;;  %1590 = vmatprep.mubr.msk.bf16.mxu1 %vm1994_vm1, %v1993_v9  ;;  %v1724_v52 = vld [vmem:[#allocation8 + $0x1c] ss:$12 sps:$4 sm:$0xff]   ;;  %v1727_v54 = vld [vmem:[#allocation8 + $0x4] ss:$12 sps:$4 sm:$0xff]   ;;  %v1729_v55 = vld [vmem:[#allocation8] ss:$12 sps:$4 sm:$0xff]  }
  0x71   : > { %1588 = vmatprep.subr.bf16.mxu1 %v1993_v9  ;;  %1119 = vmatpush1.bf16.msra.mxu0 %v1711_v39  ;;  %v1733_v56 = vld [vmem:[#allocation8 + $0x16c] ss:$12 sps:$4 sm:$0xff]   ;;  %v1735_v57 = vld [vmem:[#allocation8 + $0x168] ss:$12 sps:$4 sm:$0xff]   ;;  %v1741_v59 = vld [vmem:[#allocation8 + $0x150] ss:$12 sps:$4 sm:$0xff]  }
  0x72   : > { %1120 = vmatprep.subr.bf16.mxu0 %v1712_v40  ;;  %v1739_v58 = vld [vmem:[#allocation8 + $0x154] ss:$12 sps:$4 sm:$0xff]   ;;  %v397_v61 = vadd.s32 256, %v2225_v60  ;;  %v1744_v11 = vld [vmem:[#allocation8 + $0x1fc] ss:$12 sps:$4 sm:$0xff]   ;;  %s1549_s25 = sshll.u32 %s2070_s8, 4 }
  0x73   : > { %v1742_v15 = vld [vmem:[#allocation8 + $0x1f8] ss:$12 sps:$4 sm:$0xff]   ;;  %v1772_v37 = vld [vmem:[#allocation8 + $0x180] ss:$12 sps:$4 sm:$0xff]   ;;  %v1778_v39 = vld [vmem:[#allocation8 + $0x170] ss:$12 sps:$4 sm:$0xff]   ;;  %s1358_s3 = scalar_lea.hbm %s2352_s9, %s1549_s25 }
  0x74   : > { %1589 = vmatpush3.bf16.msra.mxu1 %v1705_v10  ;;  %vm400_vm2 = vcmp.lt.s32.totalorder %v397_v61, 300  ;;  %v1775_v36 = vld [vmem:[#allocation8 + $0xc4] ss:$12 sps:$4 sm:$0xff]   ;;  %v1777_v38 = vld [vmem:[#allocation8 + $0xc0] ss:$12 sps:$4 sm:$0xff]   ;;  %s390_s22 = scalar_lea.vmem [#allocation11], %s2175_s1 }
  0x75   : > { %1157 = vmatprep.subr.bf16.mxu1 %v1732_v42  ;;  %1121 = vmatpush1.bf16.msra.mxu0 %v1714_v43  ;;  %v2237_v3 = vsel %vm400_vm2, 1.0, %v1993_v9  ;;  %v392_v43 = vld [vmem:[%s2348_s5] sm:$0x7]  ;;  %s1360_s30 = sshll.u32 %s390_s22, 4  ;;  %vm1345_vm3 = vcmask 57344   ;;  %s1348_s7 = scalar_lea.sflag [#allocation5], %s2175_s1  ;;  %s1361_s30 = int_to_ptr.vmem [resolvable:$true] %s1360_s30 }
  0x76   : > { %1122 = vmatprep.subr.bf16.mxu0 %v1715_v45  ;;  %v2254_v45 = vrot.slane %v392_v43, %v2199_v13  ;;  %s1912_s16 = scalar_lea.vmem %s1361_s30, 16  ;;  %p2376_p0 = scmp.ne.s32.totalorder %s2368_s29, 0 }
  0x77   : > { %1591 = vmatmul.mubr.msk.bf16.vlgmr.msra.gmra.mxu1 %vm466_vm0, %v408_v8  ;;  %p1913_p12 = scmp.ne.s32.totalorder %s1361_s30, %s1912_s16  ;;  %s1995_s18 = smov [#allocation11]  }
  0x78   : > { %1189 = vmatprep.mubr.bf16.mxu1 %v1992_v1  ;;  %1158 = vmatpush1.bf16.msra.mxu1 %v1730_v41  ;;  %s1916_s20 = sshll.u32 %s1995_s18, 4  ;;  %s1917_s20 = int_to_ptr.vmem [resolvable:$false] %s1916_s20 }
  0x79   : > { %1159 = vmatprep.subr.bf16.mxu1 %v1738_v44  ;;  %1123 = vmatpush1.bf16.msra.mxu0 %v1717_v47  ;;  %v393_v44 = vld [vmem:[%s2349_s6] sm:$0x7]  ;;  %v2260_v47 = vrot.slane %v392_v43, %v2202_v14  ;;  %p1914_p5 = pnand %p1913_p12, %p2376_p0  ;;  %s1918_s8 = scalar_lea.vmem %s1917_s20, 32 }
  0x7a   : > { %1124 = vmatprep.subr.bf16.mxu0 %v1718_v48  ;;  %p1919_p10 = scmp.lt.s32.totalorder %s1361_s30, %s1917_s20  ;;  %p1920_p7 = scmp.lt.s32.totalorder %s1918_s8, %s1912_s16 }
  0x7b   : > { %p1915_p3 = pneg %p1914_p5 }
  0x7c   : > { %1160 = vmatpush1.bf16.msra.mxu1 %v1736_v46  ;;  %v2257_v46 = vrot.slane %v392_v43, %v2210_v19  ;;  %p1921_p9 = por %p1920_p7, %p1919_p10 }
  0x7d   : > { %1125 = vmatpush1.bf16.msra.mxu0 %v1720_v49  ;;  %1161 = vmatprep.subr.bf16.mxu1 %v1744_v11  ;;  %v2263_v49 = vrot.slane %v393_v44, %v2199_v13  ;;  %v1787_v11 = vld [vmem:[#allocation8 + $0x128] ss:$12 sps:$4 sm:$0xff]  }
  0x7e   : > { %1126 = vmatprep.subr.bf16.mxu0 %v1721_v50  ;;  %v2266_v50 = vrot.slane %v393_v44, %v2210_v19  ;;  %p1922_p2 = pnand %p1921_p9, %p1915_p3 }
  0x80   : > { %1162 = vmatpush1.bf16.msra.mxu1 %v1742_v15  ;;  %v1788_v15 = vld [vmem:[#allocation8 + $0x68] ss:$12 sps:$4 sm:$0xff]  }
  0x81   : > { %1127 = vmatpush1.bf16.msra.mxu0 %v1723_v51 }
  0x82   : > { %1128 = vmatprep.subr.bf16.mxu0 %v1724_v52 }
  0x85   : > { %1129 = vmatpush1.bf16.msra.mxu0 %v1726_v53 }
  0x86   : > { %1130 = vmatprep.subr.bf16.mxu0 %v1727_v54  ;;  %v2272_v54 = vrot.slane %v393_v44, %v2202_v14 }
  0x89   : > { %1131 = vmatpush1.bf16.msra.mxu0 %v1729_v55 }
  0x8a   : > { %1132 = vmatprep.subr.bf16.mxu0 %v1733_v56 }
  0x8d   : > { %1133 = vmatpush2.bf16.msra.mxu0 %v1735_v57 }
  0x8e   : > { %1134 = vmatprep.subr.bf16.mxu0 %v1739_v58 }
  0x91   : > { %1135 = vmatpush2.bf16.msra.mxu0 %v1741_v59 }
 0x12f   : > { %v504_v17 = vpop.f32.mrf.mxu1 }
 0x130   : > { %v2214_v23 = vadd.f32 %v504_v17, %v422_v18  ;;  %v1747_v17 = vld [vmem:[#allocation8 + $0x138] ss:$12 sps:$4 sm:$0xff]  }
 0x131   : > { %v506_v20 = vpop.f32.mrf.mxu1  ;;  %v1750_v18 = vld [vmem:[#allocation8 + $0x1e4] ss:$12 sps:$4 sm:$0xff]  }
 0x132   : > { %v2212_v21 = vadd.f32 %v506_v20, %v426_v16  ;;  %v551_v28 = vmax.f32 %v2214_v23, 0.0  ;;  %v1745_v16 = vld [vmem:[#allocation8 + $0x13c] ss:$12 sps:$4 sm:$0xff]   ;;  %v1748_v20 = vld [vmem:[#allocation8 + $0x1e0] ss:$12 sps:$4 sm:$0xff]   ;;  %1163 = vmatprep.subr.bf16.mxu1 %v1750_v18 }
 0x133   : > { %v508_v22 = vpop.f32.mrf.mxu1  ;;  %1136 = vmatprep.subr.bf16.mxu0 %v1745_v16  ;;  %v1756_v23 = vld [vmem:[#allocation8 + $0x1cc] ss:$12 sps:$4 sm:$0xff]   ;;  %1164 = vmatpush1.bf16.msra.mxu1 %v1748_v20  ;;  %v1789_v16 = vld [vmem:[#allocation8 + $0x1e8] ss:$12 sps:$4 sm:$0xff]   ;;  %v1791_v18 = vld [vmem:[#allocation8 + $0x50] ss:$12 sps:$4 sm:$0xff]  }
 0x134   : > { %v552_v26 = vmax.f32 %v2212_v21, 0.0  ;;  %1137 = vmatpush2.bf16.msra.mxu0 %v1747_v17  ;;  %v1751_v21 = vld [vmem:[#allocation8 + $0x124] ss:$12 sps:$4 sm:$0xff]   ;;  %v1753_v22 = vld [vmem:[#allocation8 + $0x120] ss:$12 sps:$4 sm:$0xff]   ;;  %1165 = vmatprep.subr.bf16.mxu1 %v1756_v23 }
 0x135   : > { %v509_v25 = vpop.f32.mrf.mxu1  ;;  %1138 = vmatprep.subr.bf16.mxu0 %v1751_v21  ;;  %v1790_v17 = vld [vmem:[#allocation8 + $0x110] ss:$12 sps:$4 sm:$0xff]   ;;  %v1793_v21 = vld [vmem:[#allocation8 + $0xf8] ss:$12 sps:$4 sm:$0xff]  }
 0x136   : > { %v554_v32 = vadd.f32 %v552_v26, %v551_v28  ;;  %v1754_v25 = vld [vmem:[#allocation8 + $0x1c8] ss:$12 sps:$4 sm:$0xff]   ;;  %v1792_v20 = vld [vmem:[#allocation8 + $0x1d0] ss:$12 sps:$4 sm:$0xff]   ;;  %v1795_v23 = vld [vmem:[#allocation8 + $0x1b8] ss:$12 sps:$4 sm:$0xff]  }
 0x137   : > { %v545_v27 = vpop.f32.mrf.mxu1  ;;  %1166 = vmatpush1.bf16.msra.mxu1 %v1754_v25  ;;  %v1797_v25 = vld [vmem:[#allocation8 + $0x20] ss:$12 sps:$4 sm:$0xff]  }
 0x138   : > { %v2219_v29 = vadd.f32 %v545_v27, %v430_v24  ;;  %v1757_v24 = vld [vmem:[#allocation8 + $0x10c] ss:$12 sps:$4 sm:$0xff]   ;;  %1139 = vmatpush2.bf16.msra.mxu0 %v1753_v22  ;;  %v1762_v27 = vld [vmem:[#allocation8 + $0x1b4] ss:$12 sps:$4 sm:$0xff]  }
 0x139   : > { %v1592_v30 = vpop.f32.mrf.mxu1  ;;  %1140 = vmatprep.subr.bf16.mxu0 %v1757_v24  ;;  %1167 = vmatprep.subr.bf16.mxu1 %v1762_v27  ;;  %v1794_v22 = vld [vmem:[#allocation8 + $0x38] ss:$12 sps:$4 sm:$0xff]   ;;  %v1796_v24 = vld [vmem:[#allocation8 + $0xe0] ss:$12 sps:$4 sm:$0xff]   ;;  %v1799_v27 = vld [vmem:[#allocation8 + $0xc8] ss:$12 sps:$4 sm:$0xff]  }
 0x13a   : > { %v553_v31 = vmax.f32 %v2219_v29, 0.0  ;;  %v1760_v29 = vld [vmem:[#allocation8 + $0x1b0] ss:$12 sps:$4 sm:$0xff]  }
 0x13b   : > { %v548_v33 = vpop.f32.mrf.mxu1  ;;  %v1765_v30 = vld [vmem:[#allocation8 + $0xf0] ss:$12 sps:$4 sm:$0xff]   ;;  %1168 = vmatpush1.bf16.msra.mxu1 %v1760_v29  ;;  %v1801_v29 = vld [vmem:[#allocation8 + $0x188] ss:$12 sps:$4 sm:$0xff]  }
 0x13c   : > { %v555_v34 = vadd.f32 %v554_v32, %v553_v31  ;;  %v1769_v32 = vld [vmem:[#allocation8 + $0xdc] ss:$12 sps:$4 sm:$0xff]   ;;  %v1766_v33 = vld [vmem:[#allocation8 + $0x198] ss:$12 sps:$4 sm:$0xff]  }
 0x13d   : > { %v1593_v35 = vpop.f32.mrf.mxu1 }
 0x13e   : > { %556 = vadd.xlane.f32.xlu0 %v555_v34  ;;  %v1771_v34 = vld [vmem:[#allocation8 + $0xd8] ss:$12 sps:$4 sm:$0xff]  }
 0x13f   : > { %v1774_v35 = vld [vmem:[#allocation8 + $0x184] ss:$12 sps:$4 sm:$0xff]  }
 0x1c7   : > { %v557_v62 = vpop.xlane.xlu0 %556 }
 0x1c8   : > { %v558_v63 = vmul.f32 0.0033333334, %v557_v62  ;;  %v1779_v62 = vld [vmem:[#allocation8 + $0xb0] ss:$12 sps:$4 sm:$0xff]  }
 0x1ca   : > { %v2228_v0 = vsub.f32 %v551_v28, %v558_v63  ;;  %v2232_v1 = vsub.f32 %v552_v26, %v558_v63  ;;  %v2234_v2 = vsub.f32 %v553_v31, %v558_v63  ;;  %v1759_v26 = vld [vmem:[#allocation8 + $0x108] ss:$12 sps:$4 sm:$0xff]  }
 0x1cb   : > { %v1763_v28 = vld [vmem:[#allocation8 + $0xf4] ss:$12 sps:$4 sm:$0xff]   ;;  %1141 = vmatpush2.bf16.msra.mxu0 %v1759_v26  ;;  %v1768_v31 = vld [vmem:[#allocation8 + $0x19c] ss:$12 sps:$4 sm:$0xff]  }
 0x1cc   : > { %v562_v4 = vmul.f32 %v2228_v0, %v2228_v0  ;;  %v563_v5 = vmul.f32 %v2232_v1, %v2232_v1  ;;  %v564_v6 = vmul.f32 %v2234_v2, %v2234_v2  ;;  %1142 = vmatprep.subr.bf16.mxu0 %v1763_v28  ;;  %1169 = vmatprep.subr.bf16.mxu1 %v1768_v31  ;;  %v1798_v26 = vld [vmem:[#allocation8 + $0x1a0] ss:$12 sps:$4 sm:$0xff]   ;;  %v1800_v28 = vld [vmem:[#allocation8 + $0x8] ss:$12 sps:$4 sm:$0xff]  }
 0x1cd   : > { %1170 = vmatpush1.bf16.msra.mxu1 %v1766_v33 }
 0x1ce   : > { %v567_v7 = vmul.f32 %v2237_v3, %v564_v6  ;;  %v568_v8 = vadd.f32 %v563_v5, %v562_v4  ;;  %1171 = vmatprep.subr.bf16.mxu1 %v1774_v35  ;;  %v1781_v4 = vld [vmem:[#allocation8 + $0x158] ss:$12 sps:$4 sm:$0xff]  }
 0x1cf   : > { %1143 = vmatpush2.bf16.msra.mxu0 %v1765_v30  ;;  %v1782_v5 = vld [vmem:[#allocation8 + $0x98] ss:$12 sps:$4 sm:$0xff]  }
 0x1d0   : > { %v569_v10 = vadd.f32 %v568_v8, %v567_v7  ;;  %1144 = vmatprep.subr.bf16.mxu0 %v1769_v32  ;;  %v1783_v6 = vld [vmem:[#allocation8 + $0x218] ss:$12 sps:$4 sm:$0xff]   ;;  %v1784_v7 = vld [vmem:[#allocation8 + $0x140] ss:$12 sps:$4 sm:$0xff]  }
 0x1d1   : > { %1172 = vmatpush1.bf16.msra.mxu1 %v1772_v37  ;;  %v1785_v8 = vld [vmem:[#allocation8 + $0x80] ss:$12 sps:$4 sm:$0xff]  }
 0x1d2   : > { %570 = vadd.xlane.f32.xlu0 %v569_v10  ;;  %1555 = vmatprep.subr.bf16.mxu1 %v1778_v39  ;;  %v1786_v10 = vld [vmem:[#allocation8 + $0x200] ss:$12 sps:$4 sm:$0xff]  }
 0x1d3   : > { %1145 = vmatpush2.bf16.msra.mxu0 %v1771_v34 }
 0x1d4   : > { %1146 = vmatprep.subr.bf16.mxu0 %v1775_v36 }
 0x1d7   : > { %1147 = vmatpush2.bf16.msra.mxu0 %v1777_v38  ;;  %v715_v38 = vld [vmem:[%s2347_s4] sm:$0x7] }
 0x1d8   : > { %1594 = vmatprep.subr.bf16.mxu0 %v1993_v9  ;;  %v724_v39 = vrot.slane %v715_v38, %v2199_v13 }
 0x25b   : > { %v571_v40 = vpop.xlane.xlu0 %570 }
 0x25c   : > { %v572_v41 = vmul.f32 0.0033333334, %v571_v40 }
 0x25e   : > { %v573_v42 = vadd.f32 1e-05, %v572_v41 }
 0x260   : > { %1802 = vrsqrt.f32 %v573_v42 }
 0x26d   : > { %v1803_v48 = vpop.eup %1802 }
 0x26e   : > { %v576_v51 = vmul.f32 %v1803_v48, %v2232_v1  ;;  %v577_v52 = vmul.f32 %v1803_v48, %v2234_v2  ;;  %v575_v53 = vmul.f32 %v1803_v48, %v2228_v0  ;;  %v1780_v0 = vld [vmem:[#allocation8 + $0x230] ss:$12 sps:$4 sm:$0xff]   ;;  %v728_v48 = vrot.slane %v715_v38, %v2210_v19 }
 0x270   : > { %v595_v55 = vmul.f32 %v2254_v45, %v576_v51  ;;  %v596_v56 = vmul.f32 %v2257_v46, %v577_v52  ;;  %v594_v57 = vmul.f32 %v2260_v47, %v575_v53 }
 0x272   : > { %v614_v58 = vadd.f32 %v2263_v49, %v595_v55  ;;  %v615_v59 = vadd.f32 %v2266_v50, %v596_v56  ;;  %v613_v61 = vadd.f32 %v2272_v54, %v594_v57 }
 0x274   : > { %v617_v63 = vpack.c.bf16 %v614_v58, %v614_v58  ;;  %v618_v1 = vpack.c.bf16 %v615_v59, %v615_v59  ;;  %v616_v2 = vpack.c.bf16 %v613_v61, %v613_v61 }
 0x276   : > { %1148 = vmatprep.mubr.bf16.mxu0 %v617_v63  ;;  %1190 = vmatmul.mubr.bf16.vlgmr.msra.gmra.mxu1 %v618_v1 }
 0x277   : > { %1556 = vmatpush3.bf16.msra.mxu1 %v1779_v62  ;;  %1149 = vmatmul.mubr.bf16.vlgmr.msra.gmra.mxu0 %v616_v2 }
 0x278   : > { %1230 = vmatprep.mubr.bf16.mxu1 %v617_v63  ;;  %1595 = vmatpush3.bf16.msra.mxu0 %v1780_v0 }
 0x279   : > { %1557 = vmatprep.subr.bf16.mxu1 %v1781_v4  ;;  %1596 = vmatprep.subr.bf16.mxu0 %v1993_v9 }
 0x27a   : > { %1610 = vmatprep.mubr.msk.bf16.mxu0 %vm1994_vm1, %v1993_v9 }
 0x27b   : > { %1558 = vmatpush3.bf16.msra.mxu1 %v1782_v5 }
 0x27c   : > { %1597 = vmatpush3.bf16.msra.mxu0 %v1783_v6  ;;  %1559 = vmatprep.subr.bf16.mxu1 %v1784_v7 }
 0x27d   : > { %1598 = vmatprep.subr.bf16.mxu0 %v1993_v9 }
 0x27f   : > { %1560 = vmatpush3.bf16.msra.mxu1 %v1785_v8 }
 0x280   : > { %1599 = vmatpush3.bf16.msra.mxu0 %v1786_v10  ;;  %1561 = vmatprep.subr.bf16.mxu1 %v1787_v11 }
 0x281   : > { %1600 = vmatprep.subr.bf16.mxu0 %v1993_v9 }
 0x283   : > { %1562 = vmatpush3.bf16.msra.mxu1 %v1788_v15 }
 0x284   : > { %1601 = vmatpush3.bf16.msra.mxu0 %v1789_v16  ;;  %1563 = vmatprep.subr.bf16.mxu1 %v1790_v17 }
 0x285   : > { %1602 = vmatprep.subr.bf16.mxu0 %v1993_v9 }
 0x287   : > { %1564 = vmatpush3.bf16.msra.mxu1 %v1791_v18 }
 0x288   : > { %1603 = vmatpush3.bf16.msra.mxu0 %v1792_v20  ;;  %1565 = vmatprep.subr.bf16.mxu1 %v1793_v21  ;;  %v1335_v21 = vld [vmem:[#allocation2] sm:$0x1] }
 0x289   : > { %1604 = vmatprep.subr.bf16.mxu0 %v1993_v9  ;;  %1614 = vpush %v1335_v21 }
 0x28b   : > { %1566 = vmatpush3.bf16.msra.mxu1 %v1794_v22 }
 0x28c   : > { %1605 = vmatpush3.bf16.msra.mxu0 %v1795_v23  ;;  %1567 = vmatprep.subr.bf16.mxu1 %v1796_v24 }
 0x28d   : > { %1606 = vmatprep.subr.bf16.mxu0 %v1993_v9 }
 0x28f   : > { %1568 = vmatpush3.bf16.msra.mxu1 %v1797_v25  ;;  %v1311_v25 = vld [vmem:[#allocation9] sm:$0x7] }
 0x290   : > { %1607 = vmatpush3.bf16.msra.mxu0 %v1798_v26  ;;  %1569 = vmatprep.subr.bf16.mxu1 %v1799_v27 }
 0x291   : > { %1608 = vmatprep.subr.bf16.mxu0 %v1993_v9  ;;  %v720_v9 = vrot.slane %v715_v38, %v2202_v14 }
 0x293   : > { %1570 = vmatpush3.bf16.msra.mxu1 %v1800_v28 }
 0x294   : > { %1609 = vmatpush3.bf16.msra.mxu0 %v1801_v29 }
 0x296   : > { %1231 = vmatmul.mubr.bf16.vlgmr.msra.gmra.mxu1 %v616_v2 }
 0x297   : > { %1611 = vmatmul.mubr.bf16.vlgmr.msra.gmra.mxu0 %v618_v1 }
 0x2ba   : > { %s1615_s19 = spop %1614 }
 0x336   : > { %v1191_v30 = vpop.f32.mrf.mxu1 }
 0x337   : > { %v1150_v31 = vpop.f32.mrf.mxu0 }
 0x338   : > { %v1193_v32 = vpop.f32.mrf.mxu1  ;;  %v1151_v41 = vadd.f32 %v1150_v31, %v720_v9 }
 0x339   : > { %v1152_v33 = vpop.f32.mrf.mxu0 }
 0x33a   : > { %v1195_v34 = vpop.f32.mrf.mxu1  ;;  %v1153_v40 = vadd.f32 %v1152_v33, %v724_v39  ;;  %v1192_v52 = vadd.f32 %v1191_v30, %v1151_v41  ;;  %v1316_v30 = vrot.slane %v1311_v25, %v2202_v14  ;;  %v1320_v33 = vrot.slane %v1311_v25, %v2199_v13 }
 0x33b   : > { %v1154_v35 = vpop.f32.mrf.mxu0  ;;  %v1342_v13 = vsub.s32 %v2225_v60, %v2196_v12 }
 0x33c   : > { %v1196_v36 = vpop.f32.mrf.mxu1  ;;  %v1194_v43 = vadd.f32 %v1193_v32, %v1153_v40  ;;  %v1278_v62 = vmax.f32 %v1192_v52, 0.0 }
 0x33d   : > { %v1155_v37 = vpop.f32.mrf.mxu0 }
 0x33e   : > { %v1279_v57 = vmax.f32 %v1194_v43, 0.0  ;;  %v1324_v37 = vrot.slane %v1311_v25, %v2210_v19 }
 0x340   : > { %v1281_v0 = vadd.f32 %v1279_v57, %v1278_v62 }
 0x356   : > { %v1571_v42 = vpop.f32.mrf.mxu1 }
 0x357   : > { %v1272_v44 = vpop.f32.mrf.mxu0 }
 0x358   : > { %v1572_v51 = vpop.f32.mrf.mxu1 }
 0x359   : > { %v1573_v53 = vadd.f32 %v1572_v51, %v1571_v42  ;;  %v1612_v55 = vpop.f32.mrf.mxu0 }
 0x35a   : > { %v1574_v56 = vpop.f32.mrf.mxu1 }
 0x35b   : > { %v1233_v58 = vadd.f32 %v1573_v53, %v728_v48  ;;  %v1275_v59 = vpop.f32.mrf.mxu0 }
 0x35c   : > { %v1575_v61 = vpop.f32.mrf.mxu1 }
 0x35d   : > { %v1613_v63 = vpop.f32.mrf.mxu0  ;;  %v1273_v1 = vadd.f32 %v1272_v44, %v1233_v58 }
 0x35f   : > { %v1280_v2 = vmax.f32 %v1273_v1, 0.0 }
 0x361   : > { %v1282_v4 = vadd.f32 %v1281_v0, %v1280_v2 }
 0x363   : > { %1283 = vadd.xlane.f32.xlu1 %v1282_v4 }
 0x3ec   : > { %v1284_v5 = vpop.xlane.xlu1 %1283 }
 0x3ed   : > { %v1285_v6 = vmul.f32 0.0033333334, %v1284_v5 }
 0x3ef   : > { %v1286_v7 = vsub.f32 %v1278_v62, %v1285_v6  ;;  %v1287_v8 = vsub.f32 %v1279_v57, %v1285_v6  ;;  %v1288_v10 = vsub.f32 %v1280_v2, %v1285_v6 }
 0x3f1   : > { %v1289_v11 = vmul.f32 %v1286_v7, %v1286_v7  ;;  %v1290_v15 = vmul.f32 %v1287_v8, %v1287_v8  ;;  %v1291_v16 = vmul.f32 %v1288_v10, %v1288_v10 }
 0x3f3   : > { %v1294_v17 = vmul.f32 %v2237_v3, %v1291_v16  ;;  %v1295_v18 = vadd.f32 %v1290_v15, %v1289_v11 }
 0x3f5   : > { %v1296_v20 = vadd.f32 %v1295_v18, %v1294_v17 }
 0x3f7   : > { %1297 = vadd.xlane.f32.xlu1 %v1296_v20 }
 0x480   : > { %v1298_v22 = vpop.xlane.xlu1 %1297 }
 0x481   : > { %v1299_v23 = vmul.f32 0.0033333334, %v1298_v22 }
 0x483   : > { %v1300_v24 = vadd.f32 1e-05, %v1299_v23 }
 0x485   : > { %1804 = vrsqrt.f32 %v1300_v24 }
 0x492   : > { %v1805_v26 = vpop.eup %1804 }
 0x493   : > { %v1302_v27 = vmul.f32 %v1805_v26, %v1286_v7  ;;  %v1303_v28 = vmul.f32 %v1805_v26, %v1287_v8  ;;  %v1304_v29 = vmul.f32 %v1805_v26, %v1288_v10 }
 0x495   : > { %v1305_v31 = vmul.f32 %v1302_v27, %v2260_v47  ;;  %v1306_v3 = vmul.f32 %v1303_v28, %v2254_v45  ;;  %v1307_v32 = vmul.f32 %v1304_v29, %v2257_v46  ;;  %v1337_v46 = vstv %s1615_s19 }
 0x497   : > { %v1308_v34 = vadd.f32 %v1305_v31, %v2272_v54  ;;  %v1309_v35 = vadd.f32 %v1306_v3, %v2263_v49  ;;  %v1310_v36 = vadd.f32 %v1307_v32, %v2266_v50 }
 0x499   : > { %v1328_v38 = vmul.f32 %v1316_v30, %v1308_v34  ;;  %v1329_v14 = vmul.f32 %v1320_v33, %v1309_v35  ;;  %v1330_v39 = vmul.f32 %v1324_v37, %v1310_v36 }
 0x49b   : > { %v1331_v47 = vadd.f32 %v1329_v14, %v1328_v38 }
 0x49d   : > { %v1332_v45 = vadd.f32 %v1331_v47, %v1330_v39 }
 0x49f   : > { %1333 = vadd.xlane.f32.xlu0 %v1332_v45 }
 0x528   : > { %v1334_v54 = vpop.xlane.xlu0 %1333 }
 0x529   : > { %v1338_v49 = vadd.f32 %v1337_v46, %v1334_v54 }
 0x52b   : > { %v1343_v19 = vrot.slane %v1338_v49, %v1342_v13 }
 0x52d   : > { %1346 = vst.msk [vmem:[%s390_s22] sm:$0x1] %vm1345_vm3, %v1343_v19 }
 0x52e   : > { %1925 = shalt.err (!%p1922_p2)
}
 0x52f   : > { %s1926_s24 = scalar_lea.hbm %s1358_s3, 16  ;;  %s1930_s27 = scalar_lea.hbm %s2352_s9, 32 }
 0x530   : > { %p1927_p6 = scmp.ne.s32.totalorder %s1358_s3, %s1926_s24  ;;  %p1931_p8 = scmp.lt.s32.totalorder %s1358_s3, %s2352_s9 }
 0x531   : > { %p1932_p1 = scmp.lt.s32.totalorder %s1930_s27, %s1926_s24 }
 0x532   : > { %p1928_p13 = pnand %p1927_p6, %p2376_p0 }
 0x533   : > { %p1933_p11 = por %p1932_p1, %p1931_p8 }
 0x534   : > { %p1929_p4 = pneg %p1928_p13 }
 0x536   : > { %p1934_p12 = pnand %p1933_p11, %p1929_p4 }
 0x538   : > { %1937 = shalt.err (!%p1934_p12)
}
 0x539   : > { %1630 = dma.vmem_to_hbm [thread:$0]  (%p2376_p0), %s1361_s30, 16, %s1358_s3, %s1348_s7  }
 0x53a PF: > { %s1372_s25 = sand.u32 1, %s1972_s11   ;;  %p2377_p5 = scmp.ne.s32.totalorder %s2361_s17, 0 }
 0x53b   : > { %p2378_p3 = scmp.ge.s32.totalorder %s1984_s14, 2  ;;  %s1373_s22 = scalar_lea.sflag [#allocation5], %s1372_s25 }
 0x53d   : > { %p1647_p10 = pnand %p2378_p3, %p2377_p5 }
 0x53f   : > { %p1648_p7 = pneg %p1647_p10 }
 0x541   : > { %1967 = dma.done.wait (%p1648_p7), %s1373_s22, 16  }
 0x542   : > { %1969 = vsyncadd (%p1648_p7), %s1373_s22, 4294967280  ;;  %p26_p9 = scmp.ge.s32.totalorder %s2129_s23, 4   ;;  %s2379_s11 = smov %s1976_s12 }
 0x543   : > { %s2380_s12 = smov %s1980_s13  ;;  %s2381_s13 = smov %s2139_s28 }
 0x544   : > { %s2382_s14 = smov %s2129_s23  ;;  %28 = sbr.rel (!%p26_p9) target bundleno = 11 (0xb), region = 113 }
 0x549   :  { %1377 = vsyncpa [#allocation4], 1 }
 0x54a   :  { %1379 = vsyncpa [#allocation4 + $0x1], 1 }
 0x54b   :  { %1380 = vsyncpa [#allocation7], 1 }
 0x54c   :  { %1381 = vsyncpa [#allocation10], 1 }
 0x54d   :  { %1382 = vsyncpa [#allocation5], 1 }
 0x54e   :  { %1384 = vsyncpa [#allocation5 + $0x1], 1 }

</bundles_post_ra>
